<compile_context>
chip_gen: v5e
topology: v5e:2x2
jax: 0.10.0
libtpu: 0.0.40
codegen_flags: <defaults>
</compile_context>

<pallas_src>
import math

import jax
import jax.numpy as jnp
from jax.experimental import pallas as pl
from jax.experimental.pallas import tpu as pltpu


def _round_up(v, m):
    return (v + m - 1) // m * m


def _geglu_kernel(a_ref, g_ref, o_ref):
    """out = a * gelu_tanh(gate); a/gate halves arrive as separately DMA'd tiles."""
    g = g_ref[...].astype(jnp.float32)
    gelu_g = jax.nn.gelu(g, approximate=True)  # tanh form -> EUP slot
    o_ref[...] = a_ref[...] * gelu_g.astype(o_ref.dtype)


def _vmem_limit_bytes():
    """Device-derived scoped-VMEM limit: half of physical capacity, capped."""
    try:
        cap = pltpu.get_tpu_info().vmem_capacity_bytes
    except Exception:
        cap = 64 * 1024 * 1024  # conservative default (v7x per-TC)
    return int(min(cap // 2, 96 * 1024 * 1024))


def geglu(x):
    """GeGLU: split last dim in half, return x_half * gelu(gate_half) (tanh-approx GELU)."""
    assert x.shape[-1] % 2 == 0, "last dim must be even"
    *lead, two_h = x.shape
    h = two_h // 2
    rows = math.prod(lead) if lead else 1
    x2d = x.reshape(rows, two_h)
    itemsize = jnp.dtype(x.dtype).itemsize

    vmem_limit = _vmem_limit_bytes()
    # Double-buffered working set: 2 buffers x {a, gate, out} tiles.
    tile_budget = (vmem_limit * 3) // 4

    cost = pl.CostEstimate(
        flops=10 * rows * h,
        transcendentals=rows * h,
        bytes_accessed=3 * rows * h * itemsize,
    )

    if h % 128 == 0:
        # ---------- fast path: DMA-level a/gate split, lane-dense 128-multiple tiles ----------
        th = 128
        for cand in (1024, 512, 256):
            if h % cand == 0:
                th = cand
                break

        tr = min(1024, _round_up(rows, 8))
        while tr > 8 and 2 * 3 * tr * th * itemsize > tile_budget:
            tr = max(8, _round_up(tr // 2, 8))
        # v7x has 2 TensorCores: ensure a parallel axis has >= 2 grid steps when possible.
        if pl.cdiv(rows, tr) == 1 and (h // th) == 1 and rows > 8:
            tr = max(8, _round_up(pl.cdiv(rows, 2), 8))

        h_blocks = h // th  # gate half starts h_blocks block-columns into x2d
        grid = (pl.cdiv(rows, tr), h_blocks)

        out2d = pl.pallas_call(
            _geglu_kernel,
            out_shape=jax.ShapeDtypeStruct((rows, h), x.dtype),
            grid_spec=pl.GridSpec(
                grid=grid,
                in_specs=[
                    pl.BlockSpec((tr, th), lambda i, j: (i, j)),             # a half
                    pl.BlockSpec((tr, th), lambda i, j: (i, j + h_blocks)),  # gate half
                ],
                out_specs=pl.BlockSpec((tr, th), lambda i, j: (i, j)),
            ),
            compiler_params=pltpu.CompilerParams(
                dimension_semantics=("parallel", "parallel"),
                vmem_limit_bytes=vmem_limit,
            ),
            cost_estimate=cost,
        )(x2d, x2d)
    else:
        # ---------- fallback (h not lane-aligned): split once in XLA, full-width last-dim blocks ----------
        a2d = x2d[:, :h]
        g2d = x2d[:, h:]

        tr = min(1024, _round_up(rows, 8))
        while tr > 8 and 2 * 3 * tr * h * itemsize > tile_budget:
            tr = max(8, _round_up(tr // 2, 8))
        if pl.cdiv(rows, tr) == 1 and rows > 8:
            tr = max(8, _round_up(pl.cdiv(rows, 2), 8))

        grid = (pl.cdiv(rows, tr),)
        out2d = pl.pallas_call(
            _geglu_kernel,
            out_shape=jax.ShapeDtypeStruct((rows, h), x.dtype),
            grid_spec=pl.GridSpec(
                grid=grid,
                in_specs=[
                    pl.BlockSpec((tr, h), lambda i: (i, 0)),
                    pl.BlockSpec((tr, h), lambda i: (i, 0)),
                ],
                out_specs=pl.BlockSpec((tr, h), lambda i: (i, 0)),
            ),
            compiler_params=pltpu.CompilerParams(
                dimension_semantics=("parallel",),
                vmem_limit_bytes=vmem_limit,
            ),
            cost_estimate=cost,
        )(a2d, g2d)

    return out2d.reshape(*lead, h)


def geglu_ref(x):
    a, g = jnp.split(x, 2, axis=-1)
    return a * jax.nn.gelu(g, approximate=True)


if __name__ == "__main__":
    key = jax.random.PRNGKey(0)
    k1, k2 = jax.random.split(key)

    # Small shape matching the module's forward: batch=2, seq=8, 2*hidden=32 -> hidden=16.
    # (hidden=16 exercises the non-lane-aligned fallback path.)
    x_small = jax.random.normal(k1, (2, 8, 32), dtype=jnp.float32)
    out_small = jax.block_until_ready(geglu(x_small))
    ref_small = geglu_ref(x_small)
    assert out_small.shape == (2, 8, 16), out_small.shape
    assert jnp.allclose(out_small, ref_small, atol=1e-5, rtol=1e-5), float(
        jnp.max(jnp.abs(out_small - ref_small))
    )

    # Lane-aligned shape (hidden=128) exercising the tiled fast path.
    x_fast = jax.random.normal(k2, (2, 8, 256), dtype=jnp.float32)
    out_fast = jax.block_until_ready(geglu(x_fast))
    ref_fast = geglu_ref(x_fast)
    assert out_fast.shape == (2, 8, 128), out_fast.shape
    assert jnp.allclose(out_fast, ref_fast, atol=1e-5, rtol=1e-5), float(
        jnp.max(jnp.abs(out_fast - ref_fast))
    )

    print("KERNEL_OK")
</pallas_src>

<mosaic_0001>
module attributes {stable_mosaic.version = 11 : i64} {
  func.func @_geglu_kernel(%arg0: i32, %arg1: memref<8x16xf32, #tpu.memory_space<vmem>>, %arg2: memref<8x16xf32, #tpu.memory_space<vmem>>, %arg3: memref<8x16xf32, #tpu.memory_space<vmem>>) attributes {dimension_semantics = [#tpu.dimension_semantics<parallel>], iteration_bounds = array<i64: 2>, scalar_prefetch = 0 : i64, scratch_operands = 0 : i64, tpu.core_type = #tpu.core_type<tc>, window_params = [{transform_indices = @transform_0, window_bounds = array<i64: 8, 16>}, {transform_indices = @transform_1, window_bounds = array<i64: 8, 16>}, {transform_indices = @transform_2, window_bounds = array<i64: 8, 16>}]} {
    %c0 = arith.constant 0 : index
    %c0_0 = arith.constant 0 : index
    %0 = vector.load %arg2[%c0, %c0_0] : memref<8x16xf32, #tpu.memory_space<vmem>>, vector<8x16xf32>
    %1 = arith.mulf %0, %0 : vector<8x16xf32>
    %2 = arith.mulf %0, %1 : vector<8x16xf32>
    %cst = arith.constant 4.471500e-02 : f32
    %3 = vector.broadcast %cst : f32 to vector<8x16xf32>
    %4 = arith.mulf %3, %2 : vector<8x16xf32>
    %5 = arith.addf %0, %4 : vector<8x16xf32>
    %cst_1 = arith.constant 0.797884583 : f32
    %6 = vector.broadcast %cst_1 : f32 to vector<8x16xf32>
    %7 = arith.mulf %6, %5 : vector<8x16xf32>
    %8 = math.tanh %7 : vector<8x16xf32>
    %cst_2 = arith.constant 1.000000e+00 : f32
    %9 = vector.broadcast %cst_2 : f32 to vector<8x16xf32>
    %10 = arith.addf %9, %8 : vector<8x16xf32>
    %cst_3 = arith.constant 5.000000e-01 : f32
    %11 = vector.broadcast %cst_3 : f32 to vector<8x16xf32>
    %12 = arith.mulf %11, %10 : vector<8x16xf32>
    %13 = arith.mulf %0, %12 : vector<8x16xf32>
    %c0_4 = arith.constant 0 : index
    %c0_5 = arith.constant 0 : index
    %14 = vector.load %arg1[%c0_4, %c0_5] : memref<8x16xf32, #tpu.memory_space<vmem>>, vector<8x16xf32>
    %15 = arith.mulf %14, %13 : vector<8x16xf32>
    %c0_6 = arith.constant 0 : index
    %c0_7 = arith.constant 0 : index
    %16 = vector.load %arg3[%c0_6, %c0_7] : memref<8x16xf32, #tpu.memory_space<vmem>>, vector<8x16xf32>
    tpu.vector_store %arg3[%c0_6, %c0_7], %15 {strides = array<i32>} : memref<8x16xf32, #tpu.memory_space<vmem>>, vector<8x16xf32>,
    return
  }
  func.func @transform_0(%arg0: i32) -> (i32, i32) {
    %c0_i32 = arith.constant 0 : i32
    %c0_i32_0 = arith.constant 0 : i32
    return %arg0, %c0_i32 : i32, i32
  }
  func.func @transform_1(%arg0: i32) -> (i32, i32) {
    %c0_i32 = arith.constant 0 : i32
    %c0_i32_0 = arith.constant 0 : i32
    return %arg0, %c0_i32 : i32, i32
  }
  func.func @transform_2(%arg0: i32) -> (i32, i32) {
    %c0_i32 = arith.constant 0 : i32
    %c0_i32_0 = arith.constant 0 : i32
    return %arg0, %c0_i32 : i32, i32
  }
}

</mosaic_0001>

<bundles_post_ra>
// kernel: tpu_custom_call.1
= control target key start
LH: loop header
LB: loop body
LE: loop exit
PB: predicated region body
PF: predicated region fallthrough
CT: control target
= control target key end

     0   :  { %7 = vsyncpa [#allocation3], 0  ;;  %s703_s0 = inlined_call_operand.hbm [shape: f32[16,16], index: 0, kind: input, shape index: {}]   ;;  %s704_s1 = inlined_call_operand.hbm [shape: f32[16,16], index: 1, kind: input, shape index: {}]   ;;  %s705_s2 = inlined_call_operand.hbm [shape: f32[16,16], index: 2, kind: output, shape index: {}]  }
   0x1   :  { %9 = vsyncpa [#allocation3 + $0x1], 0 }
   0x2   :  { %10 = vsyncpa [#allocation6], 0 }
   0x3   :  { %12 = vsyncpa [#allocation6 + $0x1], 0 }
   0x4   :  { %13 = vsyncpa [#allocation4], 0 }
   0x5   :  { %15 = vsyncpa [#allocation4 + $0x1], 0  ;;  %s538_s9 = smov 0   ;;  %s540_s10 = smov 0  }
   0x6   :  { %s542_s11 = smov 0   ;;  %s544_s12 = smov 0  }
   0x7 LB: > { %s559_s13 = sadd.s32 4294967295, %s521_s12   ;;  %s323_s14 = sadd.s32 4294967294, %s521_s12   ;;  %s521_s12 = sphi %s544_s12, %s716_s12   ;;  %s517_s11 = sphi %s542_s11, %s715_s11   ;;  %s513_s10 = sphi %s540_s10, %s714_s10   ;;  %s509_s9 = sphi %s538_s9, %s713_s9  }
   0x8   : > { %s563_s15 = sadd.s32 1, %s521_s12   ;;  %s28_s16 = sadd.s32 1, %s517_s11 }
   0x9   : > { %s25_s17 = ssub.s32 %s521_s12, %s563_s15  ;;  %p35_p0 = scmp.ne.s32.totalorder %s517_s11, %s513_s10 }
   0xa   : > { %p26_p1 = scmp.eq.s32.totalorder %s25_s17, 0  ;;  %p36_p2 = scmp.eq.s32.totalorder %s521_s12, 0 }
   0xb   : > { %p41_p3 = scmp.ne.s32.totalorder %s513_s10, %s509_s9  ;;  %p42_p4 = scmp.eq.s32.totalorder %s559_s13, 0 }
   0xc   : > { %s575_s18 = scalar_select %p26_p1, %s517_s11, %s28_s16  }
   0xd   : > { %p577_p5 = por %p36_p2, %p35_p0  ;;  %p581_p6 = por %p42_p4, %p41_p3 }
   0xe   : > { %p91_p7 = scmp.eq.s32.totalorder %s559_s13, 1  ;;  %p97_p8 = scmp.eq.s32.totalorder %s323_s14, 1 }
   0xf   : > { %p355_p10 = scmp.lt.s32.totalorder %s521_s12, 2  ;;  %s597_s23 = sand.u32 1, %s517_s11  }
  0x10   : > { %p588_p11 = por %p91_p7, %p35_p0  ;;  %p592_p12 = por %p97_p8, %p41_p3 }
  0x11   : > { %s327_s24 = sshll.u32 %s521_s12, 3  ;;  %s326_s25 = sshll.u32 %s597_s23, 3 }
  0x12   : > { %s125_s28 = scalar_lea.hbm %s703_s0, %s327_s24  ;;  %s121_s30 = scalar_lea.vmem [#allocation2], %s326_s25 }
  0x13   : > { %s127_s29 = sshll.u32 %s125_s28, 4  ;;  %s129_s3 = sshll.u32 %s121_s30, 4  ;;  %s128_s29 = int_to_ptr.hbm [resolvable:$true] %s127_s29  ;;  %s130_s3 = int_to_ptr.vmem [resolvable:$true] %s129_s3 }
  0x14   : > { %p606_p13 = pnand %p355_p10, %p577_p5  ;;  %p330_p0 = scmp.ge.s32.totalorder %s521_s12, 1 }
  0x15   : > { %p153_p1 = scmp.lt.s32.totalorder %s521_s12, 3  ;;  %s118_s5 = scalar_lea.sflag [#allocation3], %s597_s23 }
  0x16   : > { %s391_s6 = sshra.s32 %s128_s29, 4  ;;  %p395_p3 = pneg %p606_p13  ;;  %s392_s6 = int_to_ptr.hbm [resolvable:$true] %s391_s6 }
  0x17   : > { %s393_s7 = scalar_lea.hbm %s392_s6, 8  ;;  %s398_s16 = scalar_lea.hbm %s703_s0, 16 }
  0x18   : > { %p394_p2 = scmp.ne.s32.totalorder %s392_s6, %s393_s7  ;;  %p399_p5 = scmp.lt.s32.totalorder %s392_s6, %s703_s0 }
  0x19   : > { %p400_p8 = scmp.lt.s32.totalorder %s398_s16, %s393_s7 }
  0x1a   : > { %p396_p4 = pnand %p395_p3, %p394_p2 }
  0x1b   : > { %p401_p10 = por %p400_p8, %p399_p5 }
  0x1c   : > { %p397_p7 = pneg %p396_p4 }
  0x1e   : > { %p402_p9 = pnand %p401_p10, %p397_p7 }
  0x20   : > { %405 = shalt.err (!%p402_p9)
}
  0x21   : > { %347 = dma.hbm_to_vmem [thread:$0]  (!%p606_p13), %s128_s29, 128, %s130_s3, %s118_s5  }
  0x22   : > { %p630_p2 = pnand %p330_p0, %p153_p1  ;;  %s144_s30 = scalar_lea.hbm %s704_s1, %s327_s24 }
  0x23   : > { %s146_s6 = sshll.u32 %s144_s30, 4  ;;  %s140_s7 = scalar_lea.vmem [#allocation5], %s326_s25  ;;  %s147_s6 = int_to_ptr.hbm [resolvable:$true] %s146_s6 }
  0x24   : > { %s148_s8 = sshll.u32 %s140_s7, 4  ;;  %s137_s14 = scalar_lea.sflag [#allocation6], %s597_s23  ;;  %s149_s8 = int_to_ptr.vmem [resolvable:$true] %s148_s8 }
  0x25   : > { %s421_s16 = sshra.s32 %s147_s6, 4  ;;  %s428_s5 = scalar_lea.hbm %s704_s1, 16  ;;  %s422_s16 = int_to_ptr.hbm [resolvable:$true] %s421_s16 }
  0x26   : > { %s423_s17 = scalar_lea.hbm %s422_s16, 8  ;;  %p429_p4 = scmp.lt.s32.totalorder %s422_s16, %s704_s1 }
  0x27   : > { %p424_p9 = scmp.ne.s32.totalorder %s422_s16, %s423_s17  ;;  %p430_p7 = scmp.lt.s32.totalorder %s428_s5, %s423_s17 }
  0x29   : > { %p426_p0 = pnand %p424_p9, %p395_p3  ;;  %p431_p5 = por %p430_p7, %p429_p4 }
  0x2b   : > { %p427_p1 = pneg %p426_p0 }
  0x2d   : > { %p432_p8 = pnand %p431_p5, %p427_p1 }
  0x2f   : > { %435 = shalt.err (!%p432_p8)
}
  0x30   : > { %350 = dma.hbm_to_vmem [thread:$0]  (!%p606_p13), %s147_s6, 128, %s149_s8, %s137_s14  }
  0x31   : > { %157 = sbr.rel (%p630_p2) target bundleno = 86 (0x56), region = 28  ;;  %s652_s23 = sand.u32 (!%p630_p2), 1, %s513_s10  }
  0x32   : > { %s655_s25 = sshll.u32 (!%p630_p2), %s652_s23, 3  ;;  %s160_s27 = scalar_lea.sflag (!%p630_p2), [#allocation3], %s652_s23 }
  0x33   : > { %s163_s28 = scalar_lea.vmem (!%p630_p2), [#allocation2], %s655_s25 }
  0x36   : > { %496 = dma.done.wait (%p581_p6), %s160_s27, 128  }
  0x37   : > { %498 = vsyncadd (%p581_p6), %s160_s27, 4294967168  ;;  %s170_s4 = scalar_lea.sflag [#allocation6], %s652_s23  ;;  %s173_s26 = scalar_lea.vmem [#allocation5], %s655_s25 }
  0x38   : > { %500 = dma.done.wait (%p581_p6), %s170_s4, 128  }
  0x39   : > { %502 = vsyncadd (%p581_p6), %s170_s4, 4294967168  ;;  %v200_v0 = vld [vmem:[%s173_s26] sm:$0xff]  ;;  %s335_s30 = sshll.u32 %s559_s13, 3  ;;  %v210_v9 = vld [vmem:[%s163_s28] sm:$0xff]  ;;  %s199_s20 = scalar_lea.vmem [#allocation7], %s655_s25  ;;  %vm212_vm0 = vcmask 130048  }
  0x3a   : > { %v201_v1 = vmul.f32 %v200_v0, %v200_v0  ;;  %s225_s8 = scalar_lea.hbm %s705_s2, %s335_s30  ;;  %s227_s14 = sshll.u32 %s199_s20, 4  ;;  %s228_s14 = int_to_ptr.vmem [resolvable:$true] %s227_s14 }
  0x3b   : > { %s229_s16 = sshll.u32 %s225_s8, 4  ;;  %s215_s17 = scalar_lea.sflag [#allocation4], %s652_s23  ;;  %s230_s16 = int_to_ptr.hbm [resolvable:$true] %s229_s16 }
  0x3c   : > { %v202_v2 = vmul.f32 %v201_v1, %v200_v0  ;;  %s465_s13 = sshra.s32 %s230_s16, 4  ;;  %s471_s19 = scalar_lea.hbm %s705_s2, 16  ;;  %s466_s13 = int_to_ptr.hbm [resolvable:$true] %s465_s13 }
  0x3d   : > { %s467_s29 = scalar_lea.hbm %s466_s13, 8  ;;  %p472_p10 = scmp.lt.s32.totalorder %s466_s13, %s705_s2 }
  0x3e   : > { %v203_v3 = vmul.f32 0.044715, %v202_v2  ;;  %p468_p6 = scmp.ne.s32.totalorder %s466_s13, %s467_s29  ;;  %p473_p2 = scmp.lt.s32.totalorder %s471_s19, %s467_s29 }
  0x40   : > { %v204_v4 = vadd.f32 %v203_v3, %v200_v0  ;;  %p469_p13 = pnand %p468_p6, %p588_p11  ;;  %p474_p9 = por %p473_p2, %p472_p10 }
  0x42   : > { %v205_v5 = vmul.f32 0.7978846, %v204_v4  ;;  %p470_p3 = pneg %p469_p13 }
  0x44   : > { %389 = vtanh.f32 %v205_v5  ;;  %p475_p0 = pnand %p474_p9, %p470_p3 }
  0x4a   : > { %v390_v6 = vpop.eup %389 }
  0x4b   : > { %v207_v7 = vadd.f32 1.0, %v390_v6 }
  0x4d   : > { %v208_v8 = vmul.f32 0.5, %v207_v7 }
  0x4f   : > { %v209_v10 = vmul.f32 %v208_v8, %v200_v0 }
  0x51   : > { %v211_v11 = vmul.f32 %v210_v9, %v209_v10 }
  0x53   : > { %213 = vst.msk [vmem:[%s199_s20] sm:$0xff] %vm212_vm0, %v211_v11 }
  0x54   : > { %478 = shalt.err (!%p475_p0)
}
  0x55   : > { %342 = dma.vmem_to_hbm [thread:$0]  (%p588_p11), %s228_s14, 128, %s230_s16, %s215_s17  }
  0x56 PF: > { %s241_s23 = sand.u32 1, %s509_s9   ;;  %p712_p1 = scmp.ge.s32.totalorder %s521_s12, 2 }
  0x57   : > { %s242_s27 = scalar_lea.sflag [#allocation4], %s241_s23 }
  0x58   : > { %p352_p4 = pnand %p712_p1, %p592_p12 }
  0x5a   : > { %p353_p7 = pneg %p352_p4 }
  0x5c   : > { %504 = dma.done.wait (%p353_p7), %s242_s27, 128  }
  0x5d   : > { %506 = vsyncadd (%p353_p7), %s242_s27, 4294967168  ;;  %p18_p5 = scmp.ge.s32.totalorder %s563_s15, 4   ;;  %s713_s9 = smov %s513_s10 }
  0x5e   : > { %s714_s10 = smov %s517_s11  ;;  %s715_s11 = smov %s575_s18 }
  0x5f   : > { %s716_s12 = smov %s563_s15  ;;  %20 = sbr.rel (!%p18_p5) target bundleno = 7 (0x7), region = 86 }
  0x64   :  { %248 = vsyncpa [#allocation3], 1 }
  0x65   :  { %250 = vsyncpa [#allocation3 + $0x1], 1 }
  0x66   :  { %251 = vsyncpa [#allocation6], 1 }
  0x67   :  { %253 = vsyncpa [#allocation6 + $0x1], 1 }
  0x68   :  { %254 = vsyncpa [#allocation4], 1 }
  0x69   :  { %256 = vsyncpa [#allocation4 + $0x1], 1 }

</bundles_post_ra>
